<compile_context>
chip_gen: v7x
topology: tpu7x:2x2x1
jax: 0.10.0
libtpu: 0.0.40
codegen_flags: <defaults>
</compile_context>

<pallas_src>
import jax
import jax.numpy as jnp
from jax import lax
from jax.experimental import pallas as pl
from jax.experimental.pallas import tpu as pltpu

GROUPS = 8
EPS = 1e-5


# ---------------------------------------------------------------------------
# Kernel helpers (operate on the lane-dense (C, N) slab, N = Bt * W)
# ---------------------------------------------------------------------------
def _conv3(h, w_pack, bias, lm, rm):
    """Conv1d(k=3, pad=1) as a single (C,3C)@(3C,N) MXU matmul.

    h:      (C, N) activations, N = Bt*W (batches concatenated along lanes)
    w_pack: (C, 3C) weights packed column-blocks [k=0 | k=1 | k=2]
    lm/rm:  (1, N) masks zeroing the wrap-around / cross-batch lanes of rolls.
    """
    N = h.shape[1]
    hm1 = pltpu.roll(h, 1, axis=1) * lm          # h[:, j-1]; zeroed where j%W==0
    hp1 = pltpu.roll(h, N - 1, axis=1) * rm      # h[:, j+1]; zeroed where j%W==W-1
    hs = jnp.concatenate([hm1, h, hp1], axis=0)  # (3C, N)
    return jnp.dot(w_pack, hs, preferred_element_type=jnp.float32) + bias


def _group_norm(h, An, P, PT):
    """GroupNorm core (no affine) over each (group, batch-segment).

    An: (C, C) same-group indicator pre-scaled by 1/(gs*W)
    P:  (N, Bt) lane-segment reduction matrix, PT: (Bt, N) its broadcast.
    """
    mean = jnp.dot(An, jnp.dot(h, P, preferred_element_type=jnp.float32),
                   preferred_element_type=jnp.float32)                # (C, Bt)
    d = h - jnp.dot(mean, PT, preferred_element_type=jnp.float32)
    var = jnp.dot(An, jnp.dot(d * d, P, preferred_element_type=jnp.float32),
                  preferred_element_type=jnp.float32)                 # (C, Bt)
    inv = lax.rsqrt(var + EPS)
    return d * jnp.dot(inv, PT, preferred_element_type=jnp.float32)


def _resblock_kernel(x_ref, s1_ref, t1_ref,
                     w1_ref, b1_ref, w2_ref, b2_ref, g2w_ref, g2b_ref,
                     an_ref, p_ref, pt_ref, lm_ref, rm_ref,
                     out_ref):
    x = x_ref[...]                    # (C, N)
    lm = lm_ref[...]                  # (1, N)
    rm = rm_ref[...]                  # (1, N)
    An = an_ref[...]                  # (C, C)
    P = p_ref[...]                    # (N, Bt)
    PT = pt_ref[...]                  # (Bt, N)

    # conv1 + GroupNorm1
    h = _conv3(x, w1_ref[...], b1_ref[...], lm, rm)
    h = _group_norm(h, An, P, PT)

    # GroupNorm1 affine fused with FiLM (precomputed per (channel, batch))
    scale = jnp.dot(s1_ref[0], PT, preferred_element_type=jnp.float32)   # (C, N)
    shift = jnp.dot(t1_ref[0], PT, preferred_element_type=jnp.float32)   # (C, N)
    h = h * scale + shift
    h = h * jax.nn.sigmoid(h)         # SiLU

    # conv2 + GroupNorm2 (+ its per-channel affine) + residual
    h2 = _conv3(h, w2_ref[...], b2_ref[...], lm, rm)
    h2 = _group_norm(h2, An, P, PT)
    out_ref[...] = x + (h2 * g2w_ref[...] + g2b_ref[...])


# ---------------------------------------------------------------------------
# Wrapper
# ---------------------------------------------------------------------------
def _pick_bt(B, W):
    """Largest divisor of B that is <= 8; fall back to B if the resulting
    lane-block would not be 128-aligned (block must then equal full array)."""
    bt = 1
    for cand in range(1, min(B, 8) + 1):
        if B % cand == 0:
            bt = cand
    if (bt * W) % 128 != 0 and bt != B:
        bt = B
    return bt


def conditional_resblock_1d(x, cond_emb, params, block_batch=None):
    B, C, W = x.shape
    assert C % GROUPS == 0, "channels must be divisible by 8 (GroupNorm groups)"
    gs = C // GROUPS

    bt = _pick_bt(B, W) if block_batch is None else block_batch
    assert B % bt == 0
    nb = B // bt
    N = bt * W

    f32 = jnp.float32

    # ---- FiLM hoisted to XLA and fused with the GroupNorm1 affine ----------
    film = cond_emb @ params["film_w"].T + params["film_b"]        # (B, 2C)
    gamma, beta = film[:, :C], film[:, C:]                          # (B, C)
    scale1 = (gamma * params["gn1_w"][None, :]).T                   # (C, B)
    shift1 = (gamma * params["gn1_b"][None, :] + beta).T            # (C, B)
    scale1 = scale1.reshape(C, nb, bt).transpose(1, 0, 2)           # (nb, C, bt)
    shift1 = shift1.reshape(C, nb, bt).transpose(1, 0, 2)

    # ---- lane-dense activations: (B, C, W) -> (C, B*W) ---------------------
    x2d = jnp.transpose(x, (1, 0, 2)).reshape(C, B * W)

    # ---- packed conv weights: (C_out, C_in, 3) -> (C, 3C) [k=0|k=1|k=2] ----
    w1p = jnp.transpose(params["conv1_w"], (0, 2, 1)).reshape(C, 3 * C)
    w2p = jnp.transpose(params["conv2_w"], (0, 2, 1)).reshape(C, 3 * C)
    b1 = params["conv1_b"].reshape(C, 1)
    b2 = params["conv2_b"].reshape(C, 1)
    g2w = params["gn2_w"].reshape(C, 1)
    g2b = params["gn2_b"].reshape(C, 1)

    # ---- constant matrices / masks (built once, resident in VMEM) ----------
    ch = jnp.arange(C)
    An = ((ch[:, None] // gs) == (ch[None, :] // gs)).astype(f32) / (gs * W)

    j = jnp.arange(N)
    seg = j // W
    P = (seg[:, None] == jnp.arange(bt)[None, :]).astype(f32)       # (N, bt)
    PT = jnp.transpose(P)                                           # (bt, N)
    lm = (j % W != 0).astype(f32).reshape(1, N)
    rm = (j % W != W - 1).astype(f32).reshape(1, N)

    def const_spec(shape):
        return pl.BlockSpec(shape, lambda i: (0,) * len(shape))

    grid_spec = pltpu.PrefetchScalarGridSpec(
        num_scalar_prefetch=0,
        grid=(nb,),
        in_specs=[
            pl.BlockSpec((C, N), lambda i: (0, i)),          # x (lane-dense)
            pl.BlockSpec((1, C, bt), lambda i: (i, 0, 0)),   # fused FiLM scale
            pl.BlockSpec((1, C, bt), lambda i: (i, 0, 0)),   # fused FiLM shift
            const_spec((C, 3 * C)), const_spec((C, 1)),      # conv1
            const_spec((C, 3 * C)), const_spec((C, 1)),      # conv2
            const_spec((C, 1)), const_spec((C, 1)),          # gn2 affine
            const_spec((C, C)),                              # An
            const_spec((N, bt)), const_spec((bt, N)),        # P, P^T
            const_spec((1, N)), const_spec((1, N)),          # roll masks
        ],
        out_specs=pl.BlockSpec((C, N), lambda i: (0, i)),
    )

    out2d = pl.pallas_call(
        _resblock_kernel,
        out_shape=jax.ShapeDtypeStruct((C, B * W), x.dtype),
        grid_spec=grid_spec,
        compiler_params=pltpu.CompilerParams(
            dimension_semantics=("parallel",),
            vmem_limit_bytes=32 * 1024 * 1024,   # safe on v5e/v6e/v7x
        ),
    )(x2d, scale1, shift1, w1p, b1, w2p, b2, g2w, g2b, An, P, PT, lm, rm)

    return out2d.reshape(C, B, W).transpose(1, 0, 2)


# ---------------------------------------------------------------------------
# Pure-JAX reference (mirrors the PyTorch forward) for correctness check.
# ---------------------------------------------------------------------------
def reference(x, cond_emb, params):
    C = x.shape[1]

    def conv1d(h, w, b):
        out = lax.conv_general_dilated(
            h, w, window_strides=(1,), padding=[(1, 1)],
            dimension_numbers=("NCH", "OIH", "NCH"))
        return out + b[None, :, None]

    def gn(h, wt, bs):
        B, C_, W = h.shape
        hg = h.reshape(B, GROUPS, (C_ // GROUPS) * W)
        mean = hg.mean(-1, keepdims=True)
        var = ((hg - mean) ** 2).mean(-1, keepdims=True)
        hn = ((hg - mean) / jnp.sqrt(var + EPS)).reshape(B, C_, W)
        return hn * wt[None, :, None] + bs[None, :, None]

    h = conv1d(x, params["conv1_w"], params["conv1_b"])
    h = gn(h, params["gn1_w"], params["gn1_b"])
    film = cond_emb @ params["film_w"].T + params["film_b"]
    gamma, beta = film[:, :C], film[:, C:]
    h = gamma[:, :, None] * h + beta[:, :, None]
    h = h * jax.nn.sigmoid(h)
    h2 = conv1d(h, params["conv2_w"], params["conv2_b"])
    h2 = gn(h2, params["gn2_w"], params["gn2_b"])
    return x + h2


if __name__ == "__main__":
    B, C, W, emb_dim = 2, 16, 128, 32   # C divisible by 8 (GroupNorm groups)
    key = jax.random.PRNGKey(0)
    keys = jax.random.split(key, 12)

    params = {
        "conv1_w": 0.1 * jax.random.normal(keys[0], (C, C, 3), jnp.float32),
        "conv1_b": 0.1 * jax.random.normal(keys[1], (C,), jnp.float32),
        "gn1_w": 1.0 + 0.1 * jax.random.normal(keys[2], (C,), jnp.float32),
        "gn1_b": 0.1 * jax.random.normal(keys[3], (C,), jnp.float32),
        "conv2_w": 0.1 * jax.random.normal(keys[4], (C, C, 3), jnp.float32),
        "conv2_b": 0.1 * jax.random.normal(keys[5], (C,), jnp.float32),
        "gn2_w": 1.0 + 0.1 * jax.random.normal(keys[6], (C,), jnp.float32),
        "gn2_b": 0.1 * jax.random.normal(keys[7], (C,), jnp.float32),
        "film_w": 0.1 * jax.random.normal(keys[8], (2 * C, emb_dim), jnp.float32),
        "film_b": 0.1 * jax.random.normal(keys[9], (2 * C,), jnp.float32),
    }
    x = jax.random.normal(keys[10], (B, C, W), jnp.float32)
    cond = jax.random.normal(keys[11], (B, emb_dim), jnp.float32)

    ref = reference(x, cond, params)

    # Default path: Bt = 2 batch elements per grid step (lane-dense N = 256).
    out = conditional_resblock_1d(x, cond, params)
    out = jax.block_until_ready(out)
    max_err = float(jnp.max(jnp.abs(out - ref)))
    assert jnp.allclose(out, ref, rtol=1e-4, atol=1e-4), f"max abs err = {max_err}"

    # Multi-step-grid path (Bt = 1, grid of 2) to exercise per-block indexing.
    out2 = conditional_resblock_1d(x, cond, params, block_batch=1)
    out2 = jax.block_until_ready(out2)
    max_err2 = float(jnp.max(jnp.abs(out2 - ref)))
    assert jnp.allclose(out2, ref, rtol=1e-4, atol=1e-4), f"max abs err = {max_err2}"

    print("KERNEL_OK")
</pallas_src>

<mosaic_0001>
module attributes {stable_mosaic.version = 11 : i64} {
  func.func @_resblock_kernel(%arg0: i32, %arg1: memref<16x256xf32, #tpu.memory_space<vmem>>, %arg2: memref<1x16x2xf32, #tpu.memory_space<vmem>>, %arg3: memref<1x16x2xf32, #tpu.memory_space<vmem>>, %arg4: memref<16x48xf32, #tpu.memory_space<vmem>>, %arg5: memref<16x1xf32, #tpu.memory_space<vmem>>, %arg6: memref<16x48xf32, #tpu.memory_space<vmem>>, %arg7: memref<16x1xf32, #tpu.memory_space<vmem>>, %arg8: memref<16x1xf32, #tpu.memory_space<vmem>>, %arg9: memref<16x1xf32, #tpu.memory_space<vmem>>, %arg10: memref<16x16xf32, #tpu.memory_space<vmem>>, %arg11: memref<256x2xf32, #tpu.memory_space<vmem>>, %arg12: memref<2x256xf32, #tpu.memory_space<vmem>>, %arg13: memref<1x256xf32, #tpu.memory_space<vmem>>, %arg14: memref<1x256xf32, #tpu.memory_space<vmem>>, %arg15: memref<16x256xf32, #tpu.memory_space<vmem>>) attributes {dimension_semantics = [#tpu.dimension_semantics<parallel>], iteration_bounds = array<i64: 1>, scalar_prefetch = 0 : i64, scratch_operands = 0 : i64, tpu.core_type = #tpu.core_type<tc>, window_params = [{transform_indices = @transform_0, window_bounds = array<i64: 16, 256>}, {transform_indices = @transform_1, window_bounds = array<i64: 1, 16, 2>}, {transform_indices = @transform_2, window_bounds = array<i64: 1, 16, 2>}, {pipeline_mode = #tpu.pipeline_mode<synchronous>, transform_indices = @transform_3, window_bounds = array<i64: 16, 48>}, {pipeline_mode = #tpu.pipeline_mode<synchronous>, transform_indices = @transform_4, window_bounds = array<i64: 16, 1>}, {pipeline_mode = #tpu.pipeline_mode<synchronous>, transform_indices = @transform_5, window_bounds = array<i64: 16, 48>}, {pipeline_mode = #tpu.pipeline_mode<synchronous>, transform_indices = @transform_6, window_bounds = array<i64: 16, 1>}, {pipeline_mode = #tpu.pipeline_mode<synchronous>, transform_indices = @transform_7, window_bounds = array<i64: 16, 1>}, {pipeline_mode = #tpu.pipeline_mode<synchronous>, transform_indices = @transform_8, window_bounds = array<i64: 16, 1>}, {pipeline_mode = #tpu.pipeline_mode<synchronous>, transform_indices = @transform_9, window_bounds = array<i64: 16, 16>}, {pipeline_mode = #tpu.pipeline_mode<synchronous>, transform_indices = @transform_10, window_bounds = array<i64: 256, 2>}, {pipeline_mode = #tpu.pipeline_mode<synchronous>, transform_indices = @transform_11, window_bounds = array<i64: 2, 256>}, {pipeline_mode = #tpu.pipeline_mode<synchronous>, transform_indices = @transform_12, window_bounds = array<i64: 1, 256>}, {pipeline_mode = #tpu.pipeline_mode<synchronous>, transform_indices = @transform_13, window_bounds = array<i64: 1, 256>}, {transform_indices = @transform_14, window_bounds = array<i64: 16, 256>}]} {
    %c0 = arith.constant 0 : index
    %c0_0 = arith.constant 0 : index
    %0 = vector.load %arg1[%c0, %c0_0] : memref<16x256xf32, #tpu.memory_space<vmem>>, vector<16x256xf32>
    %c0_1 = arith.constant 0 : index
    %c0_2 = arith.constant 0 : index
    %1 = vector.load %arg13[%c0_1, %c0_2] : memref<1x256xf32, #tpu.memory_space<vmem>>, vector<1x256xf32>
    %c0_3 = arith.constant 0 : index
    %c0_4 = arith.constant 0 : index
    %2 = vector.load %arg14[%c0_3, %c0_4] : memref<1x256xf32, #tpu.memory_space<vmem>>, vector<1x256xf32>
    %c0_5 = arith.constant 0 : index
    %c0_6 = arith.constant 0 : index
    %3 = vector.load %arg10[%c0_5, %c0_6] : memref<16x16xf32, #tpu.memory_space<vmem>>, vector<16x16xf32>
    %c0_7 = arith.constant 0 : index
    %c0_8 = arith.constant 0 : index
    %4 = vector.load %arg11[%c0_7, %c0_8] : memref<256x2xf32, #tpu.memory_space<vmem>>, vector<256x2xf32>
    %c0_9 = arith.constant 0 : index
    %c0_10 = arith.constant 0 : index
    %5 = vector.load %arg12[%c0_9, %c0_10] : memref<2x256xf32, #tpu.memory_space<vmem>>, vector<2x256xf32>
    %c0_11 = arith.constant 0 : index
    %c0_12 = arith.constant 0 : index
    %6 = vector.load %arg4[%c0_11, %c0_12] : memref<16x48xf32, #tpu.memory_space<vmem>>, vector<16x48xf32>
    %c0_13 = arith.constant 0 : index
    %c0_14 = arith.constant 0 : index
    %7 = vector.load %arg5[%c0_13, %c0_14] : memref<16x1xf32, #tpu.memory_space<vmem>>, vector<16x1xf32>
    %c1_i32 = arith.constant 1 : i32
    %8 = tpu.dynamic_rotate %0 by %c1_i32 dim 1 : vector<16x256xf32>, i32 -> vector<16x256xf32>
    %9 = vector.broadcast %1 : vector<1x256xf32> to vector<16x256xf32>
    %10 = arith.mulf %8, %9 : vector<16x256xf32>
    %c255_i32 = arith.constant 255 : i32
    %11 = tpu.dynamic_rotate %0 by %c255_i32 dim 1 : vector<16x256xf32>, i32 -> vector<16x256xf32>
    %12 = vector.broadcast %2 : vector<1x256xf32> to vector<16x256xf32>
    %13 = arith.mulf %11, %12 : vector<16x256xf32>
    %14 = tpu.concatenate %10, %0, %13 in 0 : vector<16x256xf32>, vector<16x256xf32>, vector<16x256xf32> -> vector<48x256xf32>
    %cst = arith.constant dense<0.000000e+00> : vector<16x256xf32>
    %15 = tpu.matmul %6, %14, %cst {dimension_numbers = #tpu.dot_dimension_numbers<[1], [0], [0], [1], [0, 0, 1, 1], [], []>} : vector<16x48xf32>, vector<48x256xf32>, vector<16x256xf32> -> vector<16x256xf32>
    %16 = vector.broadcast %7 : vector<16x1xf32> to vector<16x256xf32>
    %17 = arith.addf %15, %16 : vector<16x256xf32>
    %cst_15 = arith.constant dense<0.000000e+00> : vector<16x2xf32>
    %18 = tpu.matmul %17, %4, %cst_15 {dimension_numbers = #tpu.dot_dimension_numbers<[1], [0], [0], [1], [0, 0, 1, 1], [], []>} : vector<16x256xf32>, vector<256x2xf32>, vector<16x2xf32> -> vector<16x2xf32>
    %cst_16 = arith.constant dense<0.000000e+00> : vector<16x2xf32>
    %19 = tpu.matmul %3, %18, %cst_16 {dimension_numbers = #tpu.dot_dimension_numbers<[1], [0], [0], [1], [0, 0, 1, 1], [], []>} : vector<16x16xf32>, vector<16x2xf32>, vector<16x2xf32> -> vector<16x2xf32>
    %cst_17 = arith.constant dense<0.000000e+00> : vector<16x256xf32>
    %20 = tpu.matmul %19, %5, %cst_17 {dimension_numbers = #tpu.dot_dimension_numbers<[1], [0], [0], [1], [0, 0, 1, 1], [], []>} : vector<16x2xf32>, vector<2x256xf32>, vector<16x256xf32> -> vector<16x256xf32>
    %21 = arith.subf %17, %20 : vector<16x256xf32>
    %22 = arith.mulf %21, %21 : vector<16x256xf32>
    %cst_18 = arith.constant dense<0.000000e+00> : vector<16x2xf32>
    %23 = tpu.matmul %22, %4, %cst_18 {dimension_numbers = #tpu.dot_dimension_numbers<[1], [0], [0], [1], [0, 0, 1, 1], [], []>} : vector<16x256xf32>, vector<256x2xf32>, vector<16x2xf32> -> vector<16x2xf32>
    %cst_19 = arith.constant dense<0.000000e+00> : vector<16x2xf32>
    %24 = tpu.matmul %3, %23, %cst_19 {dimension_numbers = #tpu.dot_dimension_numbers<[1], [0], [0], [1], [0, 0, 1, 1], [], []>} : vector<16x16xf32>, vector<16x2xf32>, vector<16x2xf32> -> vector<16x2xf32>
    %cst_20 = arith.constant 9.99999974E-6 : f32
    %25 = vector.broadcast %cst_20 : f32 to vector<16x2xf32>
    %26 = arith.addf %24, %25 : vector<16x2xf32>
    %27 = math.rsqrt %26 : vector<16x2xf32>
    %cst_21 = arith.constant dense<0.000000e+00> : vector<16x256xf32>
    %28 = tpu.matmul %27, %5, %cst_21 {dimension_numbers = #tpu.dot_dimension_numbers<[1], [0], [0], [1], [0, 0, 1, 1], [], []>} : vector<16x2xf32>, vector<2x256xf32>, vector<16x256xf32> -> vector<16x256xf32>
    %29 = arith.mulf %21, %28 : vector<16x256xf32>
    %c0_22 = arith.constant 0 : index
    %c0_23 = arith.constant 0 : index
    %c0_24 = arith.constant 0 : index
    %30 = vector.load %arg2[%c0_22, %c0_23, %c0_24] : memref<1x16x2xf32, #tpu.memory_space<vmem>>, vector<1x16x2xf32>
    %31 = vector.shape_cast %30 : vector<1x16x2xf32> to vector<16x2xf32>
    %cst_25 = arith.constant dense<0.000000e+00> : vector<16x256xf32>
    %32 = tpu.matmul %31, %5, %cst_25 {dimension_numbers = #tpu.dot_dimension_numbers<[1], [0], [0], [1], [0, 0, 1, 1], [], []>} : vector<16x2xf32>, vector<2x256xf32>, vector<16x256xf32> -> vector<16x256xf32>
    %c0_26 = arith.constant 0 : index
    %c0_27 = arith.constant 0 : index
    %c0_28 = arith.constant 0 : index
    %33 = vector.load %arg3[%c0_26, %c0_27, %c0_28] : memref<1x16x2xf32, #tpu.memory_space<vmem>>, vector<1x16x2xf32>
    %34 = vector.shape_cast %33 : vector<1x16x2xf32> to vector<16x2xf32>
    %cst_29 = arith.constant dense<0.000000e+00> : vector<16x256xf32>
    %35 = tpu.matmul %34, %5, %cst_29 {dimension_numbers = #tpu.dot_dimension_numbers<[1], [0], [0], [1], [0, 0, 1, 1], [], []>} : vector<16x2xf32>, vector<2x256xf32>, vector<16x256xf32> -> vector<16x256xf32>
    %36 = arith.mulf %29, %32 : vector<16x256xf32>
    %37 = arith.addf %36, %35 : vector<16x256xf32>
    %38 = arith.negf %37 : vector<16x256xf32>
    %39 = math.exp %38 : vector<16x256xf32>
    %cst_30 = arith.constant 1.000000e+00 : f32
    %40 = vector.broadcast %cst_30 : f32 to vector<16x256xf32>
    %41 = arith.addf %40, %39 : vector<16x256xf32>
    %42 = arith.divf %40, %41 : vector<16x256xf32>
    %43 = arith.mulf %37, %42 : vector<16x256xf32>
    %c0_31 = arith.constant 0 : index
    %c0_32 = arith.constant 0 : index
    %44 = vector.load %arg6[%c0_31, %c0_32] : memref<16x48xf32, #tpu.memory_space<vmem>>, vector<16x48xf32>
    %c0_33 = arith.constant 0 : index
    %c0_34 = arith.constant 0 : index
    %45 = vector.load %arg7[%c0_33, %c0_34] : memref<16x1xf32, #tpu.memory_space<vmem>>, vector<16x1xf32>
    %c1_i32_35 = arith.constant 1 : i32
    %46 = tpu.dynamic_rotate %43 by %c1_i32_35 dim 1 : vector<16x256xf32>, i32 -> vector<16x256xf32>
    %47 = vector.broadcast %1 : vector<1x256xf32> to vector<16x256xf32>
    %48 = arith.mulf %46, %47 : vector<16x256xf32>
    %c255_i32_36 = arith.constant 255 : i32
    %49 = tpu.dynamic_rotate %43 by %c255_i32_36 dim 1 : vector<16x256xf32>, i32 -> vector<16x256xf32>
    %50 = vector.broadcast %2 : vector<1x256xf32> to vector<16x256xf32>
    %51 = arith.mulf %49, %50 : vector<16x256xf32>
    %52 = tpu.concatenate %48, %43, %51 in 0 : vector<16x256xf32>, vector<16x256xf32>, vector<16x256xf32> -> vector<48x256xf32>
    %cst_37 = arith.constant dense<0.000000e+00> : vector<16x256xf32>
    %53 = tpu.matmul %44, %52, %cst_37 {dimension_numbers = #tpu.dot_dimension_numbers<[1], [0], [0], [1], [0, 0, 1, 1], [], []>} : vector<16x48xf32>, vector<48x256xf32>, vector<16x256xf32> -> vector<16x256xf32>
    %54 = vector.broadcast %45 : vector<16x1xf32> to vector<16x256xf32>
    %55 = arith.addf %53, %54 : vector<16x256xf32>
    %cst_38 = arith.constant dense<0.000000e+00> : vector<16x2xf32>
    %56 = tpu.matmul %55, %4, %cst_38 {dimension_numbers = #tpu.dot_dimension_numbers<[1], [0], [0], [1], [0, 0, 1, 1], [], []>} : vector<16x256xf32>, vector<256x2xf32>, vector<16x2xf32> -> vector<16x2xf32>
    %cst_39 = arith.constant dense<0.000000e+00> : vector<16x2xf32>
    %57 = tpu.matmul %3, %56, %cst_39 {dimension_numbers = #tpu.dot_dimension_numbers<[1], [0], [0], [1], [0, 0, 1, 1], [], []>} : vector<16x16xf32>, vector<16x2xf32>, vector<16x2xf32> -> vector<16x2xf32>
    %cst_40 = arith.constant dense<0.000000e+00> : vector<16x256xf32>
    %58 = tpu.matmul %57, %5, %cst_40 {dimension_numbers = #tpu.dot_dimension_numbers<[1], [0], [0], [1], [0, 0, 1, 1], [], []>} : vector<16x2xf32>, vector<2x256xf32>, vector<16x256xf32> -> vector<16x256xf32>
    %59 = arith.subf %55, %58 : vector<16x256xf32>
    %60 = arith.mulf %59, %59 : vector<16x256xf32>
    %cst_41 = arith.constant dense<0.000000e+00> : vector<16x2xf32>
    %61 = tpu.matmul %60, %4, %cst_41 {dimension_numbers = #tpu.dot_dimension_numbers<[1], [0], [0], [1], [0, 0, 1, 1], [], []>} : vector<16x256xf32>, vector<256x2xf32>, vector<16x2xf32> -> vector<16x2xf32>
    %cst_42 = arith.constant dense<0.000000e+00> : vector<16x2xf32>
    %62 = tpu.matmul %3, %61, %cst_42 {dimension_numbers = #tpu.dot_dimension_numbers<[1], [0], [0], [1], [0, 0, 1, 1], [], []>} : vector<16x16xf32>, vector<16x2xf32>, vector<16x2xf32> -> vector<16x2xf32>
    %cst_43 = arith.constant 9.99999974E-6 : f32
    %63 = vector.broadcast %cst_43 : f32 to vector<16x2xf32>
    %64 = arith.addf %62, %63 : vector<16x2xf32>
    %65 = math.rsqrt %64 : vector<16x2xf32>
    %cst_44 = arith.constant dense<0.000000e+00> : vector<16x256xf32>
    %66 = tpu.matmul %65, %5, %cst_44 {dimension_numbers = #tpu.dot_dimension_numbers<[1], [0], [0], [1], [0, 0, 1, 1], [], []>} : vector<16x2xf32>, vector<2x256xf32>, vector<16x256xf32> -> vector<16x256xf32>
    %67 = arith.mulf %59, %66 : vector<16x256xf32>
    %c0_45 = arith.constant 0 : index
    %c0_46 = arith.constant 0 : index
    %68 = vector.load %arg8[%c0_45, %c0_46] : memref<16x1xf32, #tpu.memory_space<vmem>>, vector<16x1xf32>
    %69 = vector.broadcast %68 : vector<16x1xf32> to vector<16x256xf32>
    %70 = arith.mulf %67, %69 : vector<16x256xf32>
    %c0_47 = arith.constant 0 : index
    %c0_48 = arith.constant 0 : index
    %71 = vector.load %arg9[%c0_47, %c0_48] : memref<16x1xf32, #tpu.memory_space<vmem>>, vector<16x1xf32>
    %72 = vector.broadcast %71 : vector<16x1xf32> to vector<16x256xf32>
    %73 = arith.addf %70, %72 : vector<16x256xf32>
    %74 = arith.addf %0, %73 : vector<16x256xf32>
    %c0_49 = arith.constant 0 : index
    %c0_50 = arith.constant 0 : index
    %75 = vector.load %arg15[%c0_49, %c0_50] : memref<16x256xf32, #tpu.memory_space<vmem>>, vector<16x256xf32>
    tpu.vector_store %arg15[%c0_49, %c0_50], %74 {strides = array<i32>} : memref<16x256xf32, #tpu.memory_space<vmem>>, vector<16x256xf32>,
    return
  }
  func.func @transform_0(%arg0: i32) -> (i32, i32) {
    %c0_i32 = arith.constant 0 : i32
    %c0_i32_0 = arith.constant 0 : i32
    return %c0_i32, %arg0 : i32, i32
  }
  func.func @transform_1(%arg0: i32) -> (i32, i32, i32) {
    %c0_i32 = arith.constant 0 : i32
    %c0_i32_0 = arith.constant 0 : i32
    %c0_i32_1 = arith.constant 0 : i32
    return %arg0, %c0_i32, %c0_i32_0 : i32, i32, i32
  }
  func.func @transform_2(%arg0: i32) -> (i32, i32, i32) {
    %c0_i32 = arith.constant 0 : i32
    %c0_i32_0 = arith.constant 0 : i32
    %c0_i32_1 = arith.constant 0 : i32
    return %arg0, %c0_i32, %c0_i32_0 : i32, i32, i32
  }
  func.func @transform_3(%arg0: i32) -> (i32, i32) {
    %c0_i32 = arith.constant 0 : i32
    %c0_i32_0 = arith.constant 0 : i32
    %c0_i32_1 = arith.constant 0 : i32
    return %c0_i32, %c0_i32_0 : i32, i32
  }
  func.func @transform_4(%arg0: i32) -> (i32, i32) {
    %c0_i32 = arith.constant 0 : i32
    %c0_i32_0 = arith.constant 0 : i32
    %c0_i32_1 = arith.constant 0 : i32
    return %c0_i32, %c0_i32_0 : i32, i32
  }
  func.func @transform_5(%arg0: i32) -> (i32, i32) {
    %c0_i32 = arith.constant 0 : i32
    %c0_i32_0 = arith.constant 0 : i32
    %c0_i32_1 = arith.constant 0 : i32
    return %c0_i32, %c0_i32_0 : i32, i32
  }
  func.func @transform_6(%arg0: i32) -> (i32, i32) {
    %c0_i32 = arith.constant 0 : i32
    %c0_i32_0 = arith.constant 0 : i32
    %c0_i32_1 = arith.constant 0 : i32
    return %c0_i32, %c0_i32_0 : i32, i32
  }
  func.func @transform_7(%arg0: i32) -> (i32, i32) {
    %c0_i32 = arith.constant 0 : i32
    %c0_i32_0 = arith.constant 0 : i32
    %c0_i32_1 = arith.constant 0 : i32
    return %c0_i32, %c0_i32_0 : i32, i32
  }
  func.func @transform_8(%arg0: i32) -> (i32, i32) {
    %c0_i32 = arith.constant 0 : i32
    %c0_i32_0 = arith.constant 0 : i32
    %c0_i32_1 = arith.constant 0 : i32
    return %c0_i32, %c0_i32_0 : i32, i32
  }
  func.func @transform_9(%arg0: i32) -> (i32, i32) {
    %c0_i32 = arith.constant 0 : i32
    %c0_i32_0 = arith.constant 0 : i32
    %c0_i32_1 = arith.constant 0 : i32
    return %c0_i32, %c0_i32_0 : i32, i32
  }
  func.func @transform_10(%arg0: i32) -> (i32, i32) {
    %c0_i32 = arith.constant 0 : i32
    %c0_i32_0 = arith.constant 0 : i32
    %c0_i32_1 = arith.constant 0 : i32
    return %c0_i32, %c0_i32_0 : i32, i32
  }
  func.func @transform_11(%arg0: i32) -> (i32, i32) {
    %c0_i32 = arith.constant 0 : i32
    %c0_i32_0 = arith.constant 0 : i32
    %c0_i32_1 = arith.constant 0 : i32
    return %c0_i32, %c0_i32_0 : i32, i32
  }
  func.func @transform_12(%arg0: i32) -> (i32, i32) {
    %c0_i32 = arith.constant 0 : i32
    %c0_i32_0 = arith.constant 0 : i32
    %c0_i32_1 = arith.constant 0 : i32
    return %c0_i32, %c0_i32_0 : i32, i32
  }
  func.func @transform_13(%arg0: i32) -> (i32, i32) {
    %c0_i32 = arith.constant 0 : i32
    %c0_i32_0 = arith.constant 0 : i32
    %c0_i32_1 = arith.constant 0 : i32
    return %c0_i32, %c0_i32_0 : i32, i32
  }
  func.func @transform_14(%arg0: i32) -> (i32, i32) {
    %c0_i32 = arith.constant 0 : i32
    %c0_i32_0 = arith.constant 0 : i32
    return %c0_i32, %arg0 : i32, i32
  }
}

</mosaic_0001>

<bundles_post_ra>
// kernel: tpu_custom_call.1
= control target key start
LH: loop header
LB: loop body
LE: loop exit
PB: predicated region body
PF: predicated region fallthrough
CT: control target
= control target key end

     0   :  { %s2080_s17 = smov 1   ;;  %s2643_s0 = inlined_call_operand.vmem [shape: f32[16,256], index: 0, kind: input, shape index: {}]   ;;  %s2644_s1 = inlined_call_operand.vmem [shape: f32[1,16,2], index: 1, kind: input, shape index: {}]   ;;  %s2645_s2 = inlined_call_operand.vmem [shape: f32[1,16,2], index: 2, kind: input, shape index: {}]   ;;  %s2646_s3 = inlined_call_operand.vmem [shape: f32[16,48], index: 3, kind: input, shape index: {}]   ;;  %s2647_s4 = inlined_call_operand.vmem [shape: f32[16,1], index: 4, kind: input, shape index: {}]   ;;  %s2648_s5 = inlined_call_operand.vmem [shape: f32[16,48], index: 5, kind: input, shape index: {}]   ;;  %s2649_s6 = inlined_call_operand.vmem [shape: f32[16,1], index: 6, kind: input, shape index: {}]   ;;  %s2650_s7 = inlined_call_operand.vmem [shape: f32[16,1], index: 7, kind: input, shape index: {}]   ;;  %s2651_s8 = inlined_call_operand.vmem [shape: f32[16,1], index: 8, kind: input, shape index: {}]   ;;  %s2652_s9 = inlined_call_operand.vmem [shape: f32[16,16], index: 9, kind: input, shape index: {}]   ;;  %s2653_s10 = inlined_call_operand.vmem [shape: f32[256,2], index: 10, kind: input, shape index: {}]   ;;  %s2654_s11 = inlined_call_operand.vmem [shape: f32[2,256], index: 11, kind: input, shape index: {}]   ;;  %s2655_s12 = inlined_call_operand.vmem [shape: f32[1,256], index: 12, kind: input, shape index: {}]   ;;  %s2656_s13 = inlined_call_operand.vmem [shape: f32[1,256], index: 13, kind: input, shape index: {}]   ;;  %s2657_s14 = inlined_call_operand.hbm [shape: f32[16,256], index: 14, kind: output, shape index: {}]  }
   0x1   :  { %v2165_v0 = vld [vmem:[%s2643_s0 + $0x8] sm:$0xff]  ;;  %v2170_v1 = vld [vmem:[%s2643_s0] sm:$0xff]  ;;  %v2179_v2 = vld [vmem:[%s2643_s0 + $0x18] sm:$0xff] }
   0x2   :  { %97 = vrot.lane.b32.xlu1 %v2165_v0, %s2080_s17  ;;  %93 = vrot.lane.b32.xlu0 %v2170_v1, %s2080_s17  ;;  %v2184_v3 = vld [vmem:[%s2643_s0 + $0x10] sm:$0xff] }
   0x3   :  { %19 = vsyncpa [#allocation3], 0  ;;  %v2081_v4 = vmov 0.0   ;;  %s2082_s22 = smov 127   ;;  %v91_v5 = vld [vmem:[%s2647_s4] sm:$0xff]  ;;  %v92_v6 = vld [vmem:[%s2647_s4 + $0x8] sm:$0xff]  ;;  %v101_v50 = vlaneseq }
   0x4   :  { %232 = vmatprep.mubr.f32.mxu0 %v2081_v4  ;;  %v2083_v7 = vmov 0   ;;  %v72_v8 = vld [vmem:[%s2653_s10 + $0x80] sm:$0xff]  ;;  %v73_v9 = vld [vmem:[%s2653_s10 + $0x88] sm:$0xff]  ;;  %v74_v13 = vld [vmem:[%s2653_s10 + $0x90] sm:$0xff]  ;;  %vm161_vm2 = vcmask 392192   ;;  %vm320_vm3 = vcmask 130048  }
   0x5   :  { %2030 = vset.pattern.permute.xlu0 %v2083_v7  ;;  %2031 = vset.pattern.permute.xlu1 %v2083_v7  ;;  %v56_v10 = vld [vmem:[%s2653_s10] sm:$0xff]  ;;  %v2214_v11 = vpack.c.bf16 %v73_v9, %v72_v8  ;;  %v57_v12 = vld [vmem:[%s2653_s10 + $0x8] sm:$0xff]  ;;  %v75_v14 = vld [vmem:[%s2653_s10 + $0x98] sm:$0xff]  ;;  %v110_v51 = vshrl.u32 %v101_v50, 7  ;;  %v2331_v52 = vand.u32 127, %v101_v50  ;;  %vm418_vm4 = vcmask 1041408  }
   0x6   :  { %99 = vrot.lane.b32.xlu1 %v2179_v2, %s2080_s17  ;;  %95 = vrot.lane.b32.xlu0 %v2184_v3, %s2080_s17  ;;  %v2225_v15 = vpack.c.bf16 %v57_v12, %v56_v10  ;;  %v2227_v16 = vpack.c.bf16 %v75_v14, %v74_v13  ;;  %v58_v17 = vld [vmem:[%s2653_s10 + $0x10] sm:$0xff]  ;;  %v59_v18 = vld [vmem:[%s2653_s10 + $0x18] sm:$0xff]  ;;  %vm411_vm5 = vcmask 15360  }
   0x7   :  { %v76_v19 = vld [vmem:[%s2653_s10 + $0xa0] sm:$0xff]  ;;  %v77_v20 = vld [vmem:[%s2653_s10 + $0xa8] sm:$0xff]  ;;  %1868 = vmatprep.subr.bf16.mxu1 %v2214_v11  ;;  %v2243_v21 = vpack.c.bf16 %v59_v18, %v58_v17  ;;  %v78_v25 = vld [vmem:[%s2653_s10 + $0xb0] sm:$0xff]  ;;  %v111_v53 = vsub.s32 0, %v110_v51  ;;  %v115_v54 = vsub.s32 1, %v110_v51  ;;  %vm103_vm0 = vcmp.lt.s32.totalorder %v2331_v52, 1 }
   0x8   :  { %1870 = vmatpush3.bf16.msra.mxu1 %v2225_v15  ;;  %v2246_v22 = vpack.c.bf16 %v77_v20, %v76_v19  ;;  %v60_v23 = vld [vmem:[%s2653_s10 + $0x20] sm:$0xff]  ;;  %v61_v24 = vld [vmem:[%s2653_s10 + $0x28] sm:$0xff]  ;;  %v79_v26 = vld [vmem:[%s2653_s10 + $0xb8] sm:$0xff]  ;;  %v1859_v19 = vpack.c.bf16 %v2179_v2, %v2165_v0  ;;  %vm131_vm1 = vcmp.lt.s32.totalorder %v2331_v52, 127 }
   0x9   :  { %1872 = vmatprep.subr.bf16.mxu1 %v2227_v16  ;;  %v2261_v27 = vpack.c.bf16 %v61_v24, %v60_v23  ;;  %v2264_v28 = vpack.c.bf16 %v79_v26, %v78_v25  ;;  %v62_v29 = vld [vmem:[%s2653_s10 + $0x30] sm:$0xff]  ;;  %v63_v30 = vld [vmem:[%s2653_s10 + $0x38] sm:$0xff]  ;;  %v80_v31 = vld [vmem:[%s2653_s10 + $0xc0] sm:$0xff]  ;;  %v1861_v24 = vpack.c.bf16 %v2184_v3, %v2170_v1 }
   0xa   :  { %125 = vrot.lane.b32.xlu1 %v2184_v3, %s2082_s22  ;;  %123 = vrot.lane.b32.xlu0 %v2170_v1, %s2082_s22  ;;  %v81_v32 = vld [vmem:[%s2653_s10 + $0xc8] sm:$0xff]  ;;  %v2279_v33 = vpack.c.bf16 %v63_v30, %v62_v29  ;;  %v64_v35 = vld [vmem:[%s2653_s10 + $0x40] sm:$0xff] }
   0xb   :  { %v2282_v34 = vpack.c.bf16 %v81_v32, %v80_v31  ;;  %v65_v36 = vld [vmem:[%s2653_s10 + $0x48] sm:$0xff]  ;;  %v82_v37 = vld [vmem:[%s2653_s10 + $0xd0] sm:$0xff]  ;;  %v83_v38 = vld [vmem:[%s2653_s10 + $0xd8] sm:$0xff] }
   0xc   :  { %1874 = vmatpush3.bf16.msra.mxu1 %v2243_v21  ;;  %v2297_v39 = vpack.c.bf16 %v65_v36, %v64_v35  ;;  %v2300_v40 = vpack.c.bf16 %v83_v38, %v82_v37  ;;  %v66_v41 = vld [vmem:[%s2653_s10 + $0x50] sm:$0xff]  ;;  %v67_v42 = vld [vmem:[%s2653_s10 + $0x58] sm:$0xff]  ;;  %v84_v43 = vld [vmem:[%s2653_s10 + $0xe0] sm:$0xff] }
   0xd   :  { %1876 = vmatprep.subr.bf16.mxu1 %v2246_v22  ;;  %v85_v44 = vld [vmem:[%s2653_s10 + $0xe8] sm:$0xff]  ;;  %v2315_v45 = vpack.c.bf16 %v67_v42, %v66_v41  ;;  %v68_v47 = vld [vmem:[%s2653_s10 + $0x60] sm:$0xff]  ;;  %v70_v51 = vld [vmem:[%s2653_s10 + $0x70] sm:$0xff] }
   0xe   :  { %129 = vrot.lane.b32.xlu1 %v2179_v2, %s2082_s22  ;;  %127 = vrot.lane.b32.xlu0 %v2165_v0, %s2082_s22  ;;  %v2318_v46 = vpack.c.bf16 %v85_v44, %v84_v43  ;;  %v69_v48 = vld [vmem:[%s2653_s10 + $0x68] sm:$0xff]  ;;  %v52_v55 = vld [vmem:[%s2655_s12] sm:$0x3] }
   0xf   :  { %v2327_v49 = vpack.c.bf16 %v69_v48, %v68_v47  ;;  %v2337_v58 = vrot.slane %v52_v55, %v111_v53  ;;  %v2339_v59 = vrot.slane %v52_v55, %v115_v54  ;;  %v53_v12 = vld [vmem:[%s2656_s13] sm:$0x3]  ;;  %v90_v44 = vld [vmem:[%s2646_s3 + $0x8] sm:$0xff]  ;;  %v86_v47 = vld [vmem:[%s2653_s10 + $0xf0] sm:$0xff] }
  0x10   :  { %1878 = vmatpush3.bf16.msra.mxu1 %v2261_v27  ;;  %v2359_v20 = vrot.slane %v53_v12, %v111_v53  ;;  %v2361_v23 = vrot.slane %v53_v12, %v115_v54  ;;  %v89_v43 = vld [vmem:[%s2646_s3] sm:$0xff]  ;;  %v87_v48 = vld [vmem:[%s2653_s10 + $0xf8] sm:$0xff]  ;;  %v954_v52 = vld [vmem:[%s2648_s5 + $0x8] sm:$0xff] }
  0x11   :  { %1880 = vmatprep.subr.bf16.mxu1 %v2264_v28  ;;  %v2393_v50 = vpack.c.bf16 %v87_v48, %v86_v47  ;;  %v71_v53 = vld [vmem:[%s2653_s10 + $0x78] sm:$0xff] }
  0x12   :  { %153 = vperm.xlu0 %2030, %v91_v5   ;;  %158 = vperm.xlu1 %2031, %v92_v6   ;;  %v2401_v54 = vpack.c.bf16 %v71_v53, %v70_v51 }
  0x14   :  { %1882 = vmatpush3.bf16.msra.mxu1 %v2279_v33 }
  0x15   :  { %1884 = vmatprep.subr.bf16.mxu1 %v2282_v34 }
  0x18   :  { %1886 = vmatpush3.bf16.msra.mxu1 %v2297_v39 }
  0x19   :  { %1888 = vmatprep.subr.bf16.mxu1 %v2300_v40 }
  0x1c   :  { %1890 = vmatpush3.bf16.msra.mxu1 %v2315_v45 }
  0x1d   :  { %1892 = vmatprep.subr.bf16.mxu1 %v2318_v46 }
  0x20   :  { %1894 = vmatpush3.bf16.msra.mxu1 %v2327_v49 }
  0x21   :  { %1896 = vmatprep.subr.bf16.mxu1 %v2393_v50 }
  0x24   :  { %1898 = vmatpush3.bf16.msra.mxu1 %v2401_v54 }
  0x74   :  { %v98_v56 = vpop.permute.xlu1 %97  ;;  %v94_v57 = vpop.permute.xlu0 %93 }
  0x75   :  { %v104_v60 = vsel %vm103_vm0, %v94_v57, %v98_v56  ;;  %v106_v61 = vsel %vm103_vm0, %v98_v56, %v94_v57 }
  0x76   :  { %v119_v7 = vmul.f32 %v2337_v58, %v106_v61  ;;  %v120_v9 = vmul.f32 %v2339_v59, %v104_v60 }
  0x78   :  { %v100_v62 = vpop.permute.xlu1 %99  ;;  %v96_v63 = vpop.permute.xlu0 %95 }
  0x79   :  { %v105_v5 = vsel %vm103_vm0, %v96_v63, %v100_v62  ;;  %v107_v6 = vsel %vm103_vm0, %v100_v62, %v96_v63 }
  0x7a   :  { %v121_v8 = vmul.f32 %v2337_v58, %v107_v6  ;;  %v122_v10 = vmul.f32 %v2339_v59, %v105_v5 }
  0x7c   :  { %v126_v13 = vpop.permute.xlu1 %125  ;;  %v124_v14 = vpop.permute.xlu0 %123  ;;  %v1855_v17 = vpack.c.bf16 %v122_v10, %v120_v9  ;;  %v1857_v18 = vpack.c.bf16 %v121_v8, %v119_v7  ;;  %v2408_v8 = vld [vmem:[%s2652_s9] sm:$0xff] }
  0x7d   :  { %v2415_v9 = vld.sshfl [vmem:[%s2654_s11] sm:$0x33 pattern:$0x76325410] }
  0x7e   :  { %1856 = vmatprep.subr.bf16.mxu0 %v1855_v17  ;;  %v2419_v10 = vcombine.high %v2415_v9, %v2415_v9 }
  0x7f   :  { %1858 = vmatpush1.bf16.msra.mxu0 %v1857_v18 }
  0x80   :  { %v130_v25 = vpop.permute.xlu1 %129  ;;  %v128_v26 = vpop.permute.xlu0 %127  ;;  %1860 = vmatprep.subr.bf16.mxu0 %v1859_v19 }
  0x81   :  { %v133_v29 = vsel %vm131_vm1, %v126_v13, %v130_v25  ;;  %v135_v30 = vsel %vm131_vm1, %v130_v25, %v126_v13  ;;  %v132_v31 = vsel %vm131_vm1, %v124_v14, %v128_v26  ;;  %v134_v32 = vsel %vm131_vm1, %v128_v26, %v124_v14  ;;  %v2429_v25 = vld [vmem:[%s2652_s9 + $0x8] sm:$0xff] }
  0x82   :  { %v149_v35 = vmul.f32 %v2359_v20, %v133_v29  ;;  %v150_v36 = vmul.f32 %v2361_v23, %v135_v30  ;;  %v147_v37 = vmul.f32 %v2359_v20, %v132_v31  ;;  %v148_v38 = vmul.f32 %v2361_v23, %v134_v32 }
  0x83   :  { %1862 = vmatpush1.bf16.msra.mxu0 %v1861_v24 }
  0x84   :  { %v1863_v41 = vpack.c.bf16 %v150_v36, %v148_v38  ;;  %v1865_v42 = vpack.c.bf16 %v149_v35, %v147_v37 }
  0x86   :  { %1864 = vmatprep.subr.bf16.mxu0 %v1863_v41 }
  0x87   :  { %1866 = vmatpush1.bf16.msra.mxu0 %v1865_v42 }
  0x88   :  { %1623 = vmatprep.subr.msk.mxu0 %vm418_vm4, %v2419_v10 }
  0x8a   :  { %1618 = vmatmul.mubr.msk.f32.vlgmr.msra.gmra.mrb[0].mxu0 %vm161_vm2, %v89_v43 }
  0x8b   :  { %238 = vmatprep.mubr.f32.mxu0 %v2081_v4  ;;  %1624 = vmatpush1.msk.msra.mxu0 %vm418_vm4, %v2415_v9 }
  0x8c   :  { %1904 = vmatprep.subr.bf16.mxu0 %v2214_v11 }
  0x8e   :  { %1619 = vmatmul.mubr.msk.f32.gmra.mrb[2].mxu0 %vm161_vm2, %v90_v44 }
  0x8f   :  { %487 = vmatprep.mubr.f32.mxu0 %v2081_v4 }
  0x91   :  { %v154_v55 = vpop.permute.xlu0 %153  ;;  %v159_v62 = vpop.permute.xlu1 %158 }
 0x15d   :  { %v234_v56 = vpop.f32.mrb[0].mxu0 }
 0x15e   :  { %v236_v57 = vpop.f32.mrb[1].mxu0  ;;  %v235_v61 = vadd.f32 %v234_v56, %v154_v55 }
 0x15f   :  { %v237_v60 = vadd.f32 %v236_v57, %v154_v55 }
 0x161   :  { %v240_v63 = vpop.f32.mrb[2].mxu0  ;;  %309 = vmatprep.mubr.f32.mxu1 %v237_v60 }
 0x162   :  { %v242_v5 = vpop.f32.mrb[3].mxu0  ;;  %310 = vmatmul.mubr.f32.vlgmr.msra.gmra.mrb[0].mxu1 %v235_v61  ;;  %v241_v7 = vadd.f32 %v240_v63, %v159_v62 }
 0x163   :  { %v243_v6 = vadd.f32 %v242_v5, %v159_v62 }
 0x165   :  { %314 = vmatprep.mubr.f32.mxu1 %v243_v6 }
 0x166   :  { %315 = vmatmul.mubr.f32.gmra.mrb[2].mxu1 %v241_v7 }
 0x167   :  { %1831 = vmatprep.mubr.msk.f32.mxu1 %vm320_vm3, %v2408_v8 }
 0x235   :  { %v1691_v12 = vpop.f32.mrb[0].mxu1 }
 0x236   :  { %v1692_v13 = vpop.f32.mrb[1].mxu1 }
 0x237   :  { %v1693_v14 = vadd.f32 %v1692_v13, %v1691_v12  ;;  %v747_v12 = vld [vmem:[%s2644_s1] sm:$0xff]  ;;  %v748_v13 = vld [vmem:[%s2644_s1 + $0x8] sm:$0xff] }
 0x239   :  { %v1694_v17 = vpop.f32.mrb[2].mxu1 }
 0x23a   :  { %v1695_v18 = vpop.f32.mrb[3].mxu1 }
 0x23b   :  { %v1696_v19 = vadd.f32 %v1695_v18, %v1694_v17  ;;  %v833_v17 = vld [vmem:[%s2645_s2 + $0x8] sm:$0xff] }
 0x23d   :  { %v1899_v24 = vpack.c.bf16 %v1696_v19, %v1693_v14  ;;  %v832_v14 = vld [vmem:[%s2645_s2] sm:$0xff] }
 0x23f   :  { %1900 = vmatprep.subr.bf16.mxu1 %v1899_v24 }
 0x240   :  { %1902 = vmatpush3.bf16.msra.mxu1 %v1899_v24 }
 0x243   :  { %1832 = vmatmul.mubr.msk.f32.vlgmr.msra.gmra.mrb[4].mxu1 %vm320_vm3, %v2429_v25 }
 0x244   :  { %1838 = vmatprep.mubr.msk.f32.mxu1 %vm320_vm3, %v2408_v8 }
 0x316   :  { %v1833_v26 = vpop.f32.mrb[4].mxu1 }
 0x317   :  { %v393_v29 = vpop.f32.mrb[5].mxu1 }
 0x318   :  { %1625 = vmatmul.mubr.msk.f32.vlgmr.msra.gmra.mrb[4].mxu0 %vm411_vm5, %v393_v29 }
 0x319   :  { %493 = vmatprep.mubr.f32.mxu0 %v2081_v4  ;;  %1906 = vmatpush3.bf16.msra.mxu0 %v2225_v15 }
 0x31a   :  { %1908 = vmatprep.subr.bf16.mxu0 %v2227_v16 }
 0x31c   :  { %1626 = vmatmul.mubr.msk.f32.gmra.mrb[6].mxu0 %vm411_vm5, %v1833_v26 }
 0x31d   :  { %1910 = vmatpush3.bf16.msra.mxu0 %v2243_v21 }
 0x31e   :  { %1912 = vmatprep.subr.bf16.mxu0 %v2246_v22 }
 0x321   :  { %1914 = vmatpush3.bf16.msra.mxu0 %v2261_v27 }
 0x322   :  { %1916 = vmatprep.subr.bf16.mxu0 %v2264_v28 }
 0x325   :  { %1918 = vmatpush3.bf16.msra.mxu0 %v2279_v33 }
 0x326   :  { %1920 = vmatprep.subr.bf16.mxu0 %v2282_v34 }
 0x329   :  { %1922 = vmatpush3.bf16.msra.mxu0 %v2297_v39 }
 0x32a   :  { %1924 = vmatprep.subr.bf16.mxu0 %v2300_v40 }
 0x32d   :  { %1926 = vmatpush3.bf16.msra.mxu0 %v2315_v45 }
 0x32e   :  { %1928 = vmatprep.subr.bf16.mxu0 %v2318_v46 }
 0x331   :  { %1930 = vmatpush3.bf16.msra.mxu0 %v2327_v49 }
 0x332   :  { %1932 = vmatprep.subr.bf16.mxu0 %v2393_v50 }
 0x335   :  { %1934 = vmatpush3.bf16.msra.mxu0 %v2401_v54 }
 0x3eb   :  { %v489_v30 = vpop.f32.mrb[4].mxu0 }
 0x3ec   :  { %v2453_v31 = vsub.f32 %v235_v61, %v489_v30  ;;  %v491_v32 = vpop.f32.mrb[5].mxu0 }
 0x3ed   :  { %v2455_v35 = vsub.f32 %v237_v60, %v491_v32 }
 0x3ee   :  { %v504_v38 = vmul.f32 %v2453_v31, %v2453_v31 }
 0x3ef   :  { %v505_v36 = vmul.f32 %v2455_v35, %v2455_v35  ;;  %v495_v37 = vpop.f32.mrb[6].mxu0 }
 0x3f0   :  { %v2461_v41 = vsub.f32 %v241_v7, %v495_v37  ;;  %v497_v42 = vpop.f32.mrb[7].mxu0 }
 0x3f1   :  { %v2463_v43 = vsub.f32 %v243_v6, %v497_v42  ;;  %572 = vmatprep.mubr.f32.mxu0 %v505_v36 }
 0x3f2   :  { %573 = vmatmul.mubr.f32.vlgmr.msra.gmra.mrb[8].mxu0 %v504_v38  ;;  %v506_v47 = vmul.f32 %v2461_v41, %v2461_v41 }
 0x3f3   :  { %v507_v44 = vmul.f32 %v2463_v43, %v2463_v43 }
 0x3f5   :  { %577 = vmatprep.mubr.f32.mxu0 %v507_v44 }
 0x3f6   :  { %578 = vmatmul.mubr.f32.gmra.mrb[10].mxu0 %v506_v47 }
 0x3f7   :  { %1069 = vmatprep.mubr.f32.mxu0 %v2081_v4 }
 0x4c5   :  { %v1733_v48 = vpop.f32.mrb[8].mxu0 }
 0x4c6   :  { %v1734_v51 = vpop.f32.mrb[9].mxu0 }
 0x4c7   :  { %v1735_v53 = vadd.f32 %v1734_v51, %v1733_v48 }
 0x4c9   :  { %v1736_v55 = vpop.f32.mrb[10].mxu0 }
 0x4ca   :  { %v1737_v56 = vpop.f32.mrb[11].mxu0 }
 0x4cb   :  { %v1738_v57 = vadd.f32 %v1737_v56, %v1736_v55 }
 0x4cd   :  { %v1935_v60 = vpack.c.bf16 %v1738_v57, %v1735_v53 }
 0x4cf   :  { %1936 = vmatprep.subr.bf16.mxu1 %v1935_v60 }
 0x4d0   :  { %1938 = vmatpush3.bf16.msra.mxu1 %v1935_v60 }
 0x4d1   :  { %1629 = vmatprep.subr.msk.mxu1 %vm418_vm4, %v2419_v10 }
 0x4d3   :  { %1839 = vmatmul.mubr.msk.f32.vlgmr.msra.gmra.mrb[6].mxu1 %vm320_vm3, %v2429_v25 }
 0x4d4   :  { %1630 = vmatpush1.msk.msra.mxu1 %vm418_vm4, %v2415_v9  ;;  %730 = vmatprep.mubr.f32.mxu1 %v2081_v4 }
 0x4d5   :  { %1633 = vmatprep.subr.msk.mxu1 %vm418_vm4, %v2419_v10 }
 0x5a6   :  { %v1840_v61 = vpop.f32.mrb[6].mxu1 }
 0x5a7   :  { %v649_v62 = vpop.f32.mrb[7].mxu1  ;;  %v655_v5 = vadd.f32 1e-05, %v1840_v61 }
 0x5a8   :  { %v650_v63 = vadd.f32 1e-05, %v649_v62 }
 0x5aa   :  { %2032 = vrsqrt.f32 %v650_v63 }
 0x5ab   :  { %2034 = vrsqrt.f32 %v655_v5 }
 0x5b4   :  { %v2033_v6 = vpop.eup %2032 }
 0x5b5   :  { %1631 = vmatmul.mubr.msk.f32.vlgmr.msra.gmra.mrb[8].mxu1 %vm411_vm5, %v2033_v6  ;;  %v2035_v7 = vpop.eup %2034 }
 0x5b6   :  { %736 = vmatprep.mubr.f32.mxu1 %v2081_v4  ;;  %1634 = vmatpush1.msk.msra.mxu1 %vm418_vm4, %v2415_v9 }
 0x5b7   :  { %1637 = vmatprep.subr.msk.mxu1 %vm418_vm4, %v2419_v10 }
 0x5b9   :  { %1632 = vmatmul.mubr.msk.f32.gmra.mrb[10].mxu1 %vm411_vm5, %v2035_v7 }
 0x5ba   :  { %819 = vmatprep.mubr.f32.mxu1 %v2081_v4 }
 0x5bd   :  { %1635 = vmatmul.mubr.msk.f32.vlgmr.msra.gmra.mrb[12].mxu1 %vm411_vm5, %v747_v12 }
 0x5be   :  { %825 = vmatprep.mubr.f32.mxu1 %v2081_v4  ;;  %1638 = vmatpush1.msk.msra.mxu1 %vm418_vm4, %v2415_v9 }
 0x5bf   :  { %1952 = vmatprep.subr.bf16.mxu1 %v2214_v11 }
 0x5c1   :  { %1636 = vmatmul.mubr.msk.f32.gmra.mrb[14].mxu1 %vm411_vm5, %v748_v13 }
 0x5c2   :  { %904 = vmatprep.mubr.f32.mxu1 %v2081_v4 }
 0x5c5   :  { %1639 = vmatmul.mubr.msk.f32.vlgmr.msra.gmra.mrb[16].mxu1 %vm411_vm5, %v832_v14 }
 0x5c6   :  { %910 = vmatprep.mubr.f32.mxu1 %v2081_v4  ;;  %1954 = vmatpush3.bf16.msra.mxu1 %v2225_v15 }
 0x5c7   :  { %1956 = vmatprep.subr.bf16.mxu1 %v2227_v16 }
 0x5c9   :  { %1640 = vmatmul.mubr.msk.f32.gmra.mrb[18].mxu1 %vm411_vm5, %v833_v17 }
 0x5ca   :  { %1958 = vmatpush3.bf16.msra.mxu1 %v2243_v21 }
 0x5cb   :  { %1960 = vmatprep.subr.bf16.mxu1 %v2246_v22 }
 0x5ce   :  { %1962 = vmatpush3.bf16.msra.mxu1 %v2261_v27 }
 0x5cf   :  { %1964 = vmatprep.subr.bf16.mxu1 %v2264_v28 }
 0x5d2   :  { %1966 = vmatpush3.bf16.msra.mxu1 %v2279_v33 }
 0x5d3   :  { %1968 = vmatprep.subr.bf16.mxu1 %v2282_v34 }
 0x5d6   :  { %1970 = vmatpush3.bf16.msra.mxu1 %v2297_v39 }
 0x5d7   :  { %1972 = vmatprep.subr.bf16.mxu1 %v2300_v40 }
 0x5da   :  { %1974 = vmatpush3.bf16.msra.mxu1 %v2315_v45 }
 0x5db   :  { %1976 = vmatprep.subr.bf16.mxu1 %v2318_v46 }
 0x5de   :  { %1978 = vmatpush3.bf16.msra.mxu1 %v2327_v49 }
 0x5df   :  { %1980 = vmatprep.subr.bf16.mxu1 %v2393_v50 }
 0x5e2   :  { %1982 = vmatpush3.bf16.msra.mxu1 %v2401_v54 }
 0x688   :  { %v732_v18 = vpop.f32.mrb[8].mxu1 }
 0x689   :  { %v734_v19 = vpop.f32.mrb[9].mxu1  ;;  %v743_v29 = vmul.f32 %v732_v18, %v2453_v31 }
 0x68a   :  { %v744_v30 = vmul.f32 %v734_v19, %v2455_v35 }
 0x68c   :  { %v738_v24 = vpop.f32.mrb[10].mxu1 }
 0x68d   :  { %v740_v26 = vpop.f32.mrb[11].mxu1  ;;  %v745_v42 = vmul.f32 %v738_v24, %v2461_v41 }
 0x68e   :  { %v746_v44 = vmul.f32 %v740_v26, %v2463_v43 }
 0x690   :  { %v821_v32 = vpop.f32.mrb[12].mxu1 }
 0x691   :  { %v917_v36 = vmul.f32 %v821_v32, %v743_v29  ;;  %v823_v37 = vpop.f32.mrb[13].mxu1 }
 0x692   :  { %v918_v38 = vmul.f32 %v823_v37, %v744_v30 }
 0x694   :  { %v827_v47 = vpop.f32.mrb[14].mxu1 }
 0x695   :  { %v919_v48 = vmul.f32 %v827_v47, %v745_v42  ;;  %v829_v51 = vpop.f32.mrb[15].mxu1  ;;  %v955_v47 = vld [vmem:[%s2649_s6] sm:$0xff] }
 0x696   :  { %v920_v53 = vmul.f32 %v829_v51, %v746_v44  ;;  %v956_v51 = vld [vmem:[%s2649_s6 + $0x8] sm:$0xff] }
 0x698   :  { %v906_v55 = vpop.f32.mrb[16].mxu1 }
 0x699   :  { %v921_v56 = vadd.f32 %v917_v36, %v906_v55  ;;  %v908_v57 = vpop.f32.mrb[17].mxu1  ;;  %v1563_v55 = vld [vmem:[%s2650_s7 + $0x8] sm:$0xff] }
 0x69a   :  { %v922_v60 = vadd.f32 %v918_v38, %v908_v57 }
 0x69b   :  { %v1641_v61 = vmul.f32 -1.442695, %v921_v56 }
 0x69c   :  { %v1642_v31 = vmul.f32 -1.442695, %v922_v60  ;;  %v912_v62 = vpop.f32.mrb[18].mxu1 }
 0x69d   :  { %2036 = vpow2.f32 %v1641_v61  ;;  %v923_v35 = vadd.f32 %v919_v48, %v912_v62  ;;  %v914_v63 = vpop.f32.mrb[19].mxu1  ;;  %v1562_v48 = vld [vmem:[%s2650_s7] sm:$0xff] }
 0x69e   :  { %2038 = vpow2.f32 %v1642_v31  ;;  %v924_v5 = vadd.f32 %v920_v53, %v914_v63  ;;  %v1578_v53 = vld [vmem:[%s2651_s8] sm:$0xff] }
 0x69f   :  { %v1643_v6 = vmul.f32 -1.442695, %v923_v35 }
 0x6a0   :  { %v1644_v41 = vmul.f32 -1.442695, %v924_v5 }
 0x6a1   :  { %2040 = vpow2.f32 %v1643_v6 }
 0x6a2   :  { %2042 = vpow2.f32 %v1644_v41 }
 0x6a7   :  { %v2037_v43 = vpop.eup %2036 }
 0x6a8   :  { %v2039_v7 = vpop.eup %2038  ;;  %v937_v12 = vadd.f32 1.0, %v2037_v43 }
 0x6a9   :  { %v938_v13 = vadd.f32 1.0, %v2039_v7 }
 0x6aa   :  { %2044 = vrcp.f32 %v937_v12 }
 0x6ab   :  { %v2041_v14 = vpop.eup %2040  ;;  %2046 = vrcp.f32 %v938_v13 }
 0x6ac   :  { %v2043_v17 = vpop.eup %2042  ;;  %v939_v18 = vadd.f32 1.0, %v2041_v14 }
 0x6ad   :  { %v940_v19 = vadd.f32 1.0, %v2043_v17 }
 0x6ae   :  { %2048 = vrcp.f32 %v939_v18 }
 0x6af   :  { %2050 = vrcp.f32 %v940_v19 }
 0x6b4   :  { %v2045_v24 = vpop.eup %2044 }
 0x6b5   :  { %v949_v26 = vmul.f32 %v2045_v24, %v921_v56  ;;  %v2047_v29 = vpop.eup %2046  ;;  %v1579_v56 = vld [vmem:[%s2651_s8 + $0x8] sm:$0xff] }
 0x6b6   :  { %v950_v36 = vmul.f32 %v2047_v29, %v922_v60 }
 0x6b7   :  { %957 = vrot.lane.b32.xlu1 %v949_v26, %s2080_s17 }
 0x6b8   :  { %v2049_v30 = vpop.eup %2048 }
 0x6b9   :  { %v2051_v32 = vpop.eup %2050  ;;  %v951_v37 = vmul.f32 %v2049_v30, %v923_v35 }
 0x6ba   :  { %v952_v38 = vmul.f32 %v2051_v32, %v924_v5 }
 0x6bb   :  { %v1945_v42 = vpack.c.bf16 %v951_v37, %v949_v26  ;;  %961 = vrot.lane.b32.xlu1 %v950_v36, %s2080_s17  ;;  %959 = vrot.lane.b32.xlu0 %v951_v37, %s2080_s17 }
 0x6bc   :  { %v1943_v44 = vpack.c.bf16 %v952_v38, %v950_v36 }
 0x6bf   :  { %973 = vrot.lane.b32.xlu1 %v949_v26, %s2082_s22  ;;  %963 = vrot.lane.b32.xlu0 %v952_v38, %s2080_s17 }
 0x6c3   :  { %977 = vrot.lane.b32.xlu1 %v950_v36, %s2082_s22  ;;  %975 = vrot.lane.b32.xlu0 %v951_v37, %s2082_s22 }
 0x6c7   :  { %991 = vperm.xlu1 %2031, %v955_v47   ;;  %979 = vrot.lane.b32.xlu0 %v952_v38, %s2082_s22 }
 0x6cb   :  { %1566 = vperm.xlu1 %2031, %v1562_v48   ;;  %996 = vperm.xlu0 %2030, %v956_v51  }
 0x6cf   :  { %1582 = vperm.xlu1 %2031, %v1578_v53   ;;  %1571 = vperm.xlu0 %2030, %v1563_v55  }
 0x6d3   :  { %1587 = vperm.xlu0 %2030, %v1579_v56  }
 0x729   :  { %v958_v57 = vpop.permute.xlu1 %957 }
 0x72d   :  { %v962_v60 = vpop.permute.xlu1 %961  ;;  %v960_v61 = vpop.permute.xlu0 %959 }
 0x72e   :  { %v965_v31 = vsel %vm103_vm0, %v958_v57, %v962_v60  ;;  %v967_v62 = vsel %vm103_vm0, %v962_v60, %v958_v57 }
 0x72f   :  { %v969_v41 = vmul.f32 %v967_v62, %v2337_v58  ;;  %v970_v43 = vmul.f32 %v965_v31, %v2339_v59 }
 0x731   :  { %v974_v35 = vpop.permute.xlu1 %973  ;;  %v964_v63 = vpop.permute.xlu0 %963 }
 0x732   :  { %v966_v5 = vsel %vm103_vm0, %v960_v61, %v964_v63  ;;  %v968_v6 = vsel %vm103_vm0, %v964_v63, %v960_v61 }
 0x733   :  { %v971_v7 = vmul.f32 %v968_v6, %v2337_v58  ;;  %v972_v12 = vmul.f32 %v966_v5, %v2339_v59 }
 0x735   :  { %v1941_v13 = vpack.c.bf16 %v971_v7, %v969_v41  ;;  %v978_v14 = vpop.permute.xlu1 %977  ;;  %v976_v17 = vpop.permute.xlu0 %975  ;;  %v1939_v18 = vpack.c.bf16 %v972_v12, %v970_v43 }
 0x736   :  { %v981_v19 = vsel %vm131_vm1, %v974_v35, %v978_v14  ;;  %v983_v24 = vsel %vm131_vm1, %v978_v14, %v974_v35 }
 0x737   :  { %1940 = vmatprep.subr.bf16.mxu0 %v1939_v18  ;;  %v985_v59 = vmul.f32 %v981_v19, %v2359_v20  ;;  %v986_v30 = vmul.f32 %v983_v24, %v2361_v23 }
 0x738   :  { %1942 = vmatpush1.bf16.msra.mxu0 %v1941_v13 }
 0x739   :  { %v980_v26 = vpop.permute.xlu0 %979  ;;  %1944 = vmatprep.subr.bf16.mxu0 %v1943_v44  ;;  %v953_v44 = vld [vmem:[%s2648_s5] sm:$0xff]  ;;  %s2084_s5 = smov [#allocation2]  }
 0x73a   :  { %v982_v29 = vsel %vm131_vm1, %v976_v17, %v980_v26  ;;  %v984_v58 = vsel %vm131_vm1, %v980_v26, %v976_v17  ;;  %s1607_s15 = sshll.u32 %s2084_s5, 4  ;;  %s1608_s15 = int_to_ptr.vmem [resolvable:$true] %s1607_s15 }
 0x73b   :  { %v987_v32 = vmul.f32 %v982_v29, %v2359_v20  ;;  %v988_v36 = vmul.f32 %v984_v58, %v2361_v23  ;;  %s2056_s16 = scalar_lea.vmem %s1608_s15, 512  ;;  %p2061_p1 = scmp.lt.s32.totalorder %s1608_s15, %s1608_s15 }
 0x73c   :  { %1946 = vmatpush1.bf16.msra.mxu0 %v1945_v42  ;;  %p2057_p0 = scmp.ne.s32.totalorder %s1608_s15, %s2056_s16  ;;  %p2062_p2 = scmp.lt.s32.totalorder %s2056_s16, %s2056_s16 }
 0x73d   :  { %v1949_v37 = vpack.c.bf16 %v987_v32, %v985_v59  ;;  %v1947_v38 = vpack.c.bf16 %v988_v36, %v986_v30 }
 0x73e   :  { %p2063_p3 = por %p2062_p2, %p2061_p1 }
 0x73f   :  { %1948 = vmatprep.subr.bf16.mxu0 %v1947_v38 }
 0x740   :  { %1950 = vmatpush1.bf16.msra.mxu0 %v1949_v37  ;;  %p2064_p4 = pnand %p2063_p3, %p2057_p0 }
 0x743   :  { %1645 = vmatmul.mubr.msk.f32.vlgmr.msra.gmra.mrb[12].mxu0 %vm161_vm2, %v953_v44 }
 0x744   :  { %1075 = vmatprep.mubr.f32.mxu0 %v2081_v4 }
 0x746   :  { %v992_v23 = vpop.permute.xlu1 %991 }
 0x747   :  { %1646 = vmatmul.mubr.msk.f32.gmra.mrb[14].mxu0 %vm161_vm2, %v954_v52 }
 0x748   :  { %1845 = vmatprep.mubr.msk.f32.mxu0 %vm320_vm3, %v2408_v8 }
 0x74a   :  { %v997_v53 = vpop.permute.xlu0 %996 }
 0x74e   :  { %v1572_v26 = vpop.permute.xlu0 %1571 }
 0x816   :  { %v1071_v20 = vpop.f32.mrb[12].mxu0 }
 0x817   :  { %v1073_v42 = vpop.f32.mrb[13].mxu0  ;;  %v1072_v48 = vadd.f32 %v1071_v20, %v992_v23 }
 0x818   :  { %v1074_v47 = vadd.f32 %v1073_v42, %v992_v23  ;;  %v1588_v23 = vpop.permute.xlu0 %1587 }
 0x81a   :  { %v1077_v51 = vpop.f32.mrb[14].mxu0  ;;  %1146 = vmatprep.mubr.f32.mxu1 %v1074_v47 }
 0x81b   :  { %v1079_v55 = vpop.f32.mrb[15].mxu0  ;;  %1147 = vmatmul.mubr.f32.vlgmr.msra.gmra.mrb[20].mxu1 %v1072_v48  ;;  %v1078_v57 = vadd.f32 %v1077_v51, %v997_v53 }
 0x81c   :  { %v1080_v56 = vadd.f32 %v1079_v55, %v997_v53 }
 0x81e   :  { %1151 = vmatprep.mubr.f32.mxu1 %v1080_v56 }
 0x81f   :  { %1152 = vmatmul.mubr.f32.gmra.mrb[22].mxu1 %v1078_v57 }
 0x820   :  { %1852 = vmatprep.mubr.msk.f32.mxu1 %vm320_vm3, %v2408_v8 }
 0x8ee   :  { %v1775_v60 = vpop.f32.mrb[20].mxu1 }
 0x8ef   :  { %v1776_v61 = vpop.f32.mrb[21].mxu1 }
 0x8f0   :  { %v1777_v31 = vadd.f32 %v1776_v61, %v1775_v60 }
 0x8f2   :  { %v1778_v62 = vpop.f32.mrb[22].mxu1 }
 0x8f3   :  { %v1779_v35 = vpop.f32.mrb[23].mxu1 }
 0x8f4   :  { %v1780_v63 = vadd.f32 %v1779_v35, %v1778_v62 }
 0x8f6   :  { %v1983_v5 = vpack.c.bf16 %v1780_v63, %v1777_v31 }
 0x8f8   :  { %1984 = vmatprep.subr.bf16.mxu0 %v1983_v5 }
 0x8f9   :  { %1986 = vmatpush3.bf16.msra.mxu0 %v1983_v5 }
 0x8fa   :  { %1649 = vmatprep.subr.msk.mxu0 %vm418_vm4, %v2419_v10 }
 0x8fc   :  { %1846 = vmatmul.mubr.msk.f32.vlgmr.msra.gmra.mrb[16].mxu0 %vm320_vm3, %v2429_v25 }
 0x8fd   :  { %1650 = vmatpush1.msk.msra.mxu0 %vm418_vm4, %v2415_v9  ;;  %1302 = vmatprep.mubr.f32.mxu0 %v2081_v4 }
 0x8fe   :  { %1988 = vmatprep.subr.bf16.mxu0 %v2214_v11 }
 0x9cf   :  { %v1847_v8 = vpop.f32.mrb[16].mxu0 }
 0x9d0   :  { %v1223_v6 = vpop.f32.mrb[17].mxu0 }
 0x9d1   :  { %1651 = vmatmul.mubr.msk.f32.vlgmr.msra.gmra.mrb[18].mxu0 %vm411_vm5, %v1223_v6 }
 0x9d2   :  { %1308 = vmatprep.mubr.f32.mxu0 %v2081_v4  ;;  %1990 = vmatpush3.bf16.msra.mxu0 %v2225_v15 }
 0x9d3   :  { %1992 = vmatprep.subr.bf16.mxu0 %v2227_v16 }
 0x9d5   :  { %1652 = vmatmul.mubr.msk.f32.gmra.mrb[20].mxu0 %vm411_vm5, %v1847_v8 }
 0x9d6   :  { %1994 = vmatpush3.bf16.msra.mxu0 %v2243_v21 }
 0x9d7   :  { %1996 = vmatprep.subr.bf16.mxu0 %v2246_v22 }
 0x9da   :  { %1998 = vmatpush3.bf16.msra.mxu0 %v2261_v27 }
 0x9db   :  { %2000 = vmatprep.subr.bf16.mxu0 %v2264_v28 }
 0x9de   :  { %2002 = vmatpush3.bf16.msra.mxu0 %v2279_v33 }
 0x9df   :  { %2004 = vmatprep.subr.bf16.mxu0 %v2282_v34 }
 0x9e2   :  { %2006 = vmatpush3.bf16.msra.mxu0 %v2297_v39 }
 0x9e3   :  { %2008 = vmatprep.subr.bf16.mxu0 %v2300_v40 }
 0x9e6   :  { %2010 = vmatpush3.bf16.msra.mxu0 %v2315_v45 }
 0x9e7   :  { %2012 = vmatprep.subr.bf16.mxu0 %v2318_v46 }
 0x9ea   :  { %2014 = vmatpush3.bf16.msra.mxu0 %v2327_v49 }
 0x9eb   :  { %2016 = vmatprep.subr.bf16.mxu0 %v2393_v50 }
 0x9ee   :  { %2018 = vmatpush3.bf16.msra.mxu0 %v2401_v54 }
 0xaa4   :  { %v1304_v11 = vpop.f32.mrb[18].mxu0 }
 0xaa5   :  { %v1315_v15 = vsub.f32 %v1072_v48, %v1304_v11  ;;  %v1306_v16 = vpop.f32.mrb[19].mxu0 }
 0xaa6   :  { %v1316_v21 = vsub.f32 %v1074_v47, %v1306_v16 }
 0xaa7   :  { %v1319_v28 = vmul.f32 %v1315_v15, %v1315_v15 }
 0xaa8   :  { %v1320_v22 = vmul.f32 %v1316_v21, %v1316_v21  ;;  %v1310_v27 = vpop.f32.mrb[20].mxu0 }
 0xaa9   :  { %v1317_v33 = vsub.f32 %v1078_v57, %v1310_v27  ;;  %v1312_v34 = vpop.f32.mrb[21].mxu0 }
 0xaaa   :  { %v1318_v39 = vsub.f32 %v1080_v56, %v1312_v34  ;;  %1387 = vmatprep.mubr.f32.mxu0 %v1320_v22 }
 0xaab   :  { %1388 = vmatmul.mubr.f32.vlgmr.msra.gmra.mrb[22].mxu0 %v1319_v28  ;;  %v1321_v45 = vmul.f32 %v1317_v33, %v1317_v33 }
 0xaac   :  { %v1322_v40 = vmul.f32 %v1318_v39, %v1318_v39 }
 0xaae   :  { %1392 = vmatprep.mubr.f32.mxu0 %v1322_v40 }
 0xaaf   :  { %1393 = vmatmul.mubr.f32.gmra.mrb[24].mxu0 %v1321_v45 }
 0xb7e   :  { %v1817_v46 = vpop.f32.mrb[22].mxu0 }
 0xb7f   :  { %v1818_v49 = vpop.f32.mrb[23].mxu0 }
 0xb80   :  { %v1819_v50 = vadd.f32 %v1818_v49, %v1817_v46 }
 0xb82   :  { %v1820_v54 = vpop.f32.mrb[24].mxu0 }
 0xb83   :  { %v1821_v41 = vpop.f32.mrb[25].mxu0 }
 0xb84   :  { %v1822_v43 = vadd.f32 %v1821_v41, %v1820_v54 }
 0xb86   :  { %v2019_v7 = vpack.c.bf16 %v1822_v43, %v1819_v50 }
 0xb88   :  { %2020 = vmatprep.subr.bf16.mxu1 %v2019_v7 }
 0xb89   :  { %2022 = vmatpush3.bf16.msra.mxu1 %v2019_v7 }
 0xb8a   :  { %1655 = vmatprep.subr.msk.mxu1 %vm418_vm4, %v2419_v10 }
 0xb8c   :  { %1853 = vmatmul.mubr.msk.f32.vlgmr.msra.gmra.mrb[24].mxu1 %vm320_vm3, %v2429_v25  ;;  %v1567_v25 = vpop.permute.xlu1 %1566 }
 0xb8d   :  { %1656 = vmatpush1.msk.msra.mxu1 %vm418_vm4, %v2415_v9  ;;  %1545 = vmatprep.mubr.f32.mxu1 %v2081_v4 }
 0xb90   :  { %v1583_v59 = vpop.permute.xlu1 %1582 }
 0xc5f   :  { %v1854_v12 = vpop.f32.mrb[24].mxu1 }
 0xc60   :  { %v1464_v13 = vpop.f32.mrb[25].mxu1  ;;  %v1470_v17 = vadd.f32 1e-05, %v1854_v12 }
 0xc61   :  { %v1465_v14 = vadd.f32 1e-05, %v1464_v13 }
 0xc63   :  { %2052 = vrsqrt.f32 %v1465_v14 }
 0xc64   :  { %2054 = vrsqrt.f32 %v1470_v17 }
 0xc6d   :  { %v2053_v18 = vpop.eup %2052 }
 0xc6e   :  { %1657 = vmatmul.mubr.msk.f32.vlgmr.msra.gmra.mrb[26].mxu1 %vm411_vm5, %v2053_v18  ;;  %v2055_v10 = vpop.eup %2054 }
 0xc6f   :  { %1551 = vmatprep.mubr.f32.mxu1 %v2081_v4 }
 0xc72   :  { %1658 = vmatmul.mubr.msk.f32.gmra.mrb[28].mxu1 %vm411_vm5, %v2055_v10 }
 0xd41   :  { %v1547_v19 = vpop.f32.mrb[26].mxu1 }
 0xd42   :  { %v1558_v24 = vmul.f32 %v1547_v19, %v1315_v15  ;;  %v1549_v9 = vpop.f32.mrb[27].mxu1 }
 0xd43   :  { %v1559_v29 = vmul.f32 %v1549_v9, %v1316_v21 }
 0xd44   :  { %v1574_v58 = vmul.f32 %v1567_v25, %v1558_v24 }
 0xd45   :  { %v1575_v30 = vmul.f32 %v1567_v25, %v1559_v29  ;;  %v1553_v32 = vpop.f32.mrb[28].mxu1 }
 0xd46   :  { %v1590_v36 = vadd.f32 %v1583_v59, %v1574_v58  ;;  %v1560_v37 = vmul.f32 %v1553_v32, %v1317_v33  ;;  %v1555_v38 = vpop.f32.mrb[29].mxu1 }
 0xd47   :  { %v1591_v44 = vadd.f32 %v1583_v59, %v1575_v30  ;;  %v1561_v52 = vmul.f32 %v1555_v38, %v1318_v39 }
 0xd48   :  { %v1594_v4 = vadd.f32 %v1590_v36, %v2170_v1  ;;  %v1576_v20 = vmul.f32 %v1572_v26, %v1560_v37 }
 0xd49   :  { %v1595_v42 = vadd.f32 %v1591_v44, %v2165_v0  ;;  %v1577_v47 = vmul.f32 %v1572_v26, %v1561_v52 }
 0xd4a   :  { %1598 = vst [vmem:[#allocation2] sm:$0xff] %v1594_v4  ;;  %v1592_v48 = vadd.f32 %v1588_v23, %v1576_v20 }
 0xd4b   :  { %1599 = vst [vmem:[#allocation2 + $0x8] sm:$0xff] %v1595_v42  ;;  %v1593_v51 = vadd.f32 %v1588_v23, %v1577_v47 }
 0xd4c   :  { %v1596_v53 = vadd.f32 %v1592_v48, %v2184_v3 }
 0xd4d   :  { %v1597_v55 = vadd.f32 %v1593_v51, %v2179_v2 }
 0xd4e   :  { %1600 = vst [vmem:[#allocation2 + $0x10] sm:$0xff] %v1596_v53 }
 0xd4f   :  { %1601 = vst [vmem:[#allocation2 + $0x18] sm:$0xff] %v1597_v55 }
 0xd50   :  { %2067 = shalt.err (!%p2064_p4)
}
 0xd51   :  { %s2068_s4 = scalar_lea.hbm %s2657_s14, 512 }
 0xd52   :  { %p2069_p5 = scmp.ne.s32.totalorder %s2657_s14, %s2068_s4  ;;  %p2072_p6 = scmp.lt.u32.totalorder %s2068_s4, %s2657_s14 }
 0xd54   :  { %p2074_p7 = pnand %p2072_p6, %p2069_p5 }
 0xd56   :  { %2077 = shalt.err (!%p2074_p7)
}
 0xd57   :  { %s2085_s13 = smov 256   ;;  %s2086_s21 = smov 16  }
 0xd58   :  { %1613 = dma.vmem_to_hbm [thread:$0]  %s1608_s15, 512, %s2657_s14, [#allocation3], %s2085_s13, %s2085_s13, %s2086_s21  }
 0xd59   :  { %2078 = dma.done.wait [#allocation3], 512  }
 0xd5a   :  { %2079 = vsyncadd [#allocation3], 4294966784 }
 0xd5b   :  { %1617 = vsyncpa [#allocation3], 1 }

</bundles_post_ra>
